<compile_context>
chip_gen: v6e
topology: v6e:2x2x1
jax: 0.10.0
libtpu: 0.0.40
codegen_flags: <defaults>
</compile_context>

<pallas_src>
import jax
import jax.numpy as jnp
from jax.experimental import pallas as pl
from jax.experimental.pallas import tpu as pltpu


def _conv3x3_relu_kernel(x_ref, w_ref, b_ref, o_ref):
    # x_ref: (1, K, T_HW)   im2col input tile (one batch elem, one spatial tile)
    # w_ref: (C_out, K)     full weight matrix (resident in VMEM)
    # b_ref: (C_out, 1)     bias, f32 (resident)
    # o_ref: (1, C_out, T_HW)
    acc = jnp.dot(w_ref[...], x_ref[0], preferred_element_type=jnp.float32)
    acc = acc + b_ref[...]
    o_ref[0] = jnp.maximum(acc, 0.0).astype(o_ref.dtype)


def _vmem_capacity_bytes() -> int:
    """Physical VMEM of the current generation (fallback: v7x's 64 MiB)."""
    cap = None
    try:
        cap = getattr(pltpu.get_tpu_info(), "vmem_capacity_bytes", None)
    except Exception:
        cap = None
    if not cap or cap <= 0:
        cap = 64 * 1024 * 1024
    return int(cap)


def _vmem_need_bytes(t_hw: int, k_dim: int, c_out: int,
                     in_bytes: int, out_bytes: int) -> int:
    """Estimated VMEM footprint for one pipeline configuration."""
    return (2 * k_dim * t_hw * in_bytes        # double-buffered input tile
            + 2 * c_out * t_hw * out_bytes     # double-buffered output tile
            + 2 * c_out * k_dim * in_bytes     # resident weights (+ spare buf)
            + 2 * c_out * 4                    # bias
            + (1 << 20))                       # slack for compiler temporaries


def _pick_spatial_tile(hw: int, n_batch: int, k_dim: int, c_out: int,
                       in_bytes: int, out_bytes: int, budget: int) -> int:
    """Largest lane-dense tile (multiple of 128 dividing HW) within budget."""
    if hw % 128 != 0:
        return hw  # small / odd spatial maps: one full (possibly masked) block
    cands = sorted((t for t in range(128, hw + 1, 128) if hw % t == 0),
                   reverse=True)
    if n_batch == 1:
        # Keep >= 2 parallel grid steps (v7x has 2 TensorCores per chip).
        multi = [t for t in cands if hw // t >= 2]
        if multi:
            cands = multi
    for t in cands:
        if _vmem_need_bytes(t, k_dim, c_out, in_bytes, out_bytes) <= budget:
            return t
    return cands[-1]


def conv3x3_relu(x: jax.Array, weight: jax.Array, bias: jax.Array,
                 *, compute_dtype=None) -> jax.Array:
    """relu(conv2d(x, weight, bias, stride=1, padding=1)) for NCHW input.

    compute_dtype: optional MXU operand dtype (e.g. jnp.bfloat16).  Default
    keeps the input dtype (bit-faithful to the PyTorch module); bf16 is the
    recommended fast path on all TPU generations (accumulation stays f32).
    """
    assert x.ndim == 4, "expected NCHW input"
    N, C_in, H, W = x.shape
    C_out, C_in_w, KH, KW = weight.shape
    assert (C_in_w, KH, KW) == (C_in, 3, 3)
    HW = H * W
    K = 9 * C_in
    out_dtype = x.dtype

    if compute_dtype is not None:
        x = x.astype(compute_dtype)
        weight = weight.astype(compute_dtype)

    # im2col: taps[n, t*C_in + ci, h*W + w] = x_pad[n, ci, h + kh, w + kw],
    # with t = kh*3 + kw (pure layout plumbing done by XLA).
    x_pad = jnp.pad(x, ((0, 0), (0, 0), (1, 1), (1, 1)))
    taps = jnp.stack(
        [x_pad[:, :, kh:kh + H, kw:kw + W] for kh in range(3) for kw in range(3)],
        axis=1,
    ).reshape(N, K, HW)

    # weight (C_out, C_in, 3, 3) -> (C_out, 9*C_in) matching tap-major K order.
    w_mat = jnp.transpose(weight, (0, 2, 3, 1)).reshape(C_out, K)
    b2 = bias.astype(jnp.float32).reshape(C_out, 1)

    in_bytes = jnp.dtype(taps.dtype).itemsize
    out_bytes = jnp.dtype(out_dtype).itemsize
    cap = _vmem_capacity_bytes()
    budget = max(int(cap * 0.40), 16 << 20)   # ~51 MiB on v5e/v6e, ~26 MiB on v7x
    t_hw = _pick_spatial_tile(HW, N, K, C_out, in_bytes, out_bytes, budget)
    n_s = HW // t_hw
    need = _vmem_need_bytes(t_hw, K, C_out, in_bytes, out_bytes)
    vmem_limit = int(min(max(need + (8 << 20), 32 << 20), int(cap * 0.75)))

    out_flat = pl.pallas_call(
        _conv3x3_relu_kernel,
        out_shape=jax.ShapeDtypeStruct((N, C_out, HW), out_dtype),
        grid_spec=pltpu.PrefetchScalarGridSpec(
            num_scalar_prefetch=0,
            grid=(N, n_s),
            in_specs=[
                pl.BlockSpec((1, K, t_hw), lambda n, s: (n, 0, s)),
                pl.BlockSpec((C_out, K), lambda n, s: (0, 0)),   # resident
                pl.BlockSpec((C_out, 1), lambda n, s: (0, 0)),   # resident
            ],
            out_specs=pl.BlockSpec((1, C_out, t_hw), lambda n, s: (n, 0, s)),
        ),
        compiler_params=pltpu.CompilerParams(
            dimension_semantics=("parallel", "parallel"),
            vmem_limit_bytes=vmem_limit,
        ),
    )(taps, w_mat, b2)

    return out_flat.reshape(N, C_out, H, W)


def conv3x3_relu_ref(x: jax.Array, weight: jax.Array, bias: jax.Array) -> jax.Array:
    """Pure-JAX reference matching the PyTorch module exactly."""
    out = jax.lax.conv_general_dilated(
        x, weight,
        window_strides=(1, 1),
        padding=((1, 1), (1, 1)),
        dimension_numbers=("NCHW", "OIHW", "NCHW"),
    )
    return jnp.maximum(out + bias.reshape(1, -1, 1, 1), 0.0)


if __name__ == "__main__":
    key = jax.random.PRNGKey(0)
    k_x, k_w, k_b = jax.random.split(key, 3)

    # Small shapes consistent with the CNN module: N=2, C_in=4, C_out=8, 16x16.
    N, C_in, C_out, H, W = 2, 4, 8, 16, 16
    x = jax.random.normal(k_x, (N, C_in, H, W), dtype=jnp.float32)
    weight = jax.random.normal(k_w, (C_out, C_in, 3, 3), dtype=jnp.float32)
    weight = weight * (1.0 / (C_in * 9)) ** 0.5
    bias = 0.1 * jax.random.normal(k_b, (C_out,), dtype=jnp.float32)

    ref = conv3x3_relu_ref(x, weight, bias)

    # Default path: operands in the input dtype (f32 here), tight tolerance.
    out = jax.block_until_ready(conv3x3_relu(x, weight, bias))
    assert out.shape == ref.shape and out.dtype == ref.dtype
    assert jnp.allclose(out, ref, atol=1e-4, rtol=1e-4), "f32 mismatch vs reference"

    # Recommended fast path: bf16 MXU operands, f32 accumulation.
    out_bf16 = jax.block_until_ready(
        conv3x3_relu(x, weight, bias, compute_dtype=jnp.bfloat16))
    assert out_bf16.shape == ref.shape
    assert jnp.allclose(out_bf16, ref, atol=5e-2, rtol=5e-2), "bf16 mismatch vs reference"

    print("KERNEL_OK")
</pallas_src>

<mosaic_0001>
module attributes {stable_mosaic.version = 11 : i64} {
  func.func @_conv3x3_relu_kernel(%arg0: i32, %arg1: i32, %arg2: memref<1x36x256xf32, #tpu.memory_space<vmem>>, %arg3: memref<8x36xf32, #tpu.memory_space<vmem>>, %arg4: memref<8x1xf32, #tpu.memory_space<vmem>>, %arg5: memref<1x8x256xf32, #tpu.memory_space<vmem>>) attributes {dimension_semantics = [#tpu.dimension_semantics<parallel>, #tpu.dimension_semantics<parallel>], iteration_bounds = array<i64: 2, 1>, scalar_prefetch = 0 : i64, scratch_operands = 0 : i64, tpu.core_type = #tpu.core_type<tc>, window_params = [{transform_indices = @transform_0, window_bounds = array<i64: 1, 36, 256>}, {pipeline_mode = #tpu.pipeline_mode<synchronous>, transform_indices = @transform_1, window_bounds = array<i64: 8, 36>}, {pipeline_mode = #tpu.pipeline_mode<synchronous>, transform_indices = @transform_2, window_bounds = array<i64: 8, 1>}, {transform_indices = @transform_3, window_bounds = array<i64: 1, 8, 256>}]} {
    %c0 = arith.constant 0 : index
    %c0_0 = arith.constant 0 : index
    %0 = vector.load %arg3[%c0, %c0_0] : memref<8x36xf32, #tpu.memory_space<vmem>>, vector<8x36xf32>
    %c0_1 = arith.constant 0 : index
    %c0_2 = arith.constant 0 : index
    %c0_3 = arith.constant 0 : index
    %1 = vector.load %arg2[%c0_1, %c0_2, %c0_3] : memref<1x36x256xf32, #tpu.memory_space<vmem>>, vector<1x36x256xf32>
    %2 = vector.shape_cast %1 : vector<1x36x256xf32> to vector<36x256xf32>
    %cst = arith.constant dense<0.000000e+00> : vector<8x256xf32>
    %3 = tpu.matmul %0, %2, %cst {dimension_numbers = #tpu.dot_dimension_numbers<[1], [0], [0], [1], [0, 0, 1, 1], [], []>} : vector<8x36xf32>, vector<36x256xf32>, vector<8x256xf32> -> vector<8x256xf32>
    %c0_4 = arith.constant 0 : index
    %c0_5 = arith.constant 0 : index
    %4 = vector.load %arg4[%c0_4, %c0_5] : memref<8x1xf32, #tpu.memory_space<vmem>>, vector<8x1xf32>
    %5 = vector.broadcast %4 : vector<8x1xf32> to vector<8x256xf32>
    %6 = arith.addf %3, %5 : vector<8x256xf32>
    %cst_6 = arith.constant 0.000000e+00 : f32
    %7 = vector.broadcast %cst_6 : f32 to vector<8x256xf32>
    %8 = arith.maximumf %6, %7 : vector<8x256xf32>
    %c0_7 = arith.constant 0 : index
    %c0_8 = arith.constant 0 : index
    %c0_9 = arith.constant 0 : index
    %9 = vector.load %arg5[%c0_7, %c0_8, %c0_9] : memref<1x8x256xf32, #tpu.memory_space<vmem>>, vector<1x8x256xf32>
    %10 = vector.shape_cast %9 : vector<1x8x256xf32> to vector<8x256xf32>
    %11 = vector.shape_cast %8 : vector<8x256xf32> to vector<1x8x256xf32>
    tpu.vector_store %arg5[%c0_7, %c0_8, %c0_9], %11 {strides = array<i32>} : memref<1x8x256xf32, #tpu.memory_space<vmem>>, vector<1x8x256xf32>,
    return
  }
  func.func @transform_0(%arg0: i32, %arg1: i32) -> (i32, i32, i32) {
    %c0_i32 = arith.constant 0 : i32
    %c0_i32_0 = arith.constant 0 : i32
    return %arg0, %c0_i32, %arg1 : i32, i32, i32
  }
  func.func @transform_1(%arg0: i32, %arg1: i32) -> (i32, i32) {
    %c0_i32 = arith.constant 0 : i32
    %c0_i32_0 = arith.constant 0 : i32
    %c0_i32_1 = arith.constant 0 : i32
    return %c0_i32, %c0_i32_0 : i32, i32
  }
  func.func @transform_2(%arg0: i32, %arg1: i32) -> (i32, i32) {
    %c0_i32 = arith.constant 0 : i32
    %c0_i32_0 = arith.constant 0 : i32
    %c0_i32_1 = arith.constant 0 : i32
    return %c0_i32, %c0_i32_0 : i32, i32
  }
  func.func @transform_3(%arg0: i32, %arg1: i32) -> (i32, i32, i32) {
    %c0_i32 = arith.constant 0 : i32
    %c0_i32_0 = arith.constant 0 : i32
    return %arg0, %c0_i32, %arg1 : i32, i32, i32
  }
}

</mosaic_0001>

<bundles_post_ra>
// kernel: tpu_custom_call.1
= control target key start
LH: loop header
LB: loop body
LE: loop exit
PB: predicated region body
PF: predicated region fallthrough
CT: control target
= control target key end

     0   :  { %8 = vsyncpa [#allocation3], 0  ;;  %s677_s0 = inlined_call_operand.vmem [shape: f32[2,36,256], index: 0, kind: input, shape index: {}]   ;;  %s678_s1 = inlined_call_operand.vmem [shape: f32[8,36], index: 1, kind: input, shape index: {}]   ;;  %s679_s2 = inlined_call_operand.vmem [shape: f32[8,1], index: 2, kind: input, shape index: {}]   ;;  %s680_s3 = inlined_call_operand.hbm [shape: f32[2,8,256], index: 3, kind: output, shape index: {}]  }
   0x1   :  { %10 = vsyncpa [#allocation3 + $0x1], 0  ;;  %s572_s12 = smov 0   ;;  %s574_s13 = smov 0  }
   0x2   :  { %s576_s14 = smov 0   ;;  %s578_s15 = smov 0  }
   0x3   :  { %s580_s16 = smov 0   ;;  %s582_s17 = smov 0  }
   0x4 LB: > { %s396_s18 = sadd.s32 4294967295, %s547_s17   ;;  %s397_s19 = sadd.s32 4294967294, %s547_s17   ;;  %s547_s17 = sphi %s582_s17, %s16_s17   ;;  %s543_s16 = sphi %s580_s16, %s687_s16   ;;  %s539_s15 = sphi %s578_s15, %s686_s15   ;;  %s535_s14 = sphi %s576_s14, %s685_s14   ;;  %s531_s13 = sphi %s574_s13, %s684_s13   ;;  %s527_s12 = sphi %s572_s12, %s683_s12  }
   0x5   : > { %s28_s20 = sadd.s32 1, %s543_s16  ;;  %s107_s21 = sadd.s32 1, %s535_s14 }
   0x6   : > { %p30_p0 = scmp.ge.s32.totalorder %s28_s20, 2  ;;  %p117_p1 = scmp.ne.s32.totalorder %s535_s14, %s531_s13 }
   0x7   : > { %p118_p2 = scmp.eq.s32.totalorder %s396_s18, 1  ;;  %p123_p3 = scmp.ne.s32.totalorder %s531_s13, %s527_s12 }
   0x8   : > { %s689_s20 = smov (%p30_p0, %s28_s20), 0  ;;  %p124_p5 = scmp.eq.s32.totalorder %s397_s19, 1 }
   0x9   : > { %p612_p4 = por %p118_p2, %p117_p1  ;;  %s102_s23 = ssub.s32 %s543_s16, %s689_s20 }
   0xa   : > { %p400_p6 = scmp.ge.s32.totalorder %s547_s17, 1  ;;  %p105_p7 = scmp.eq.s32.totalorder %s102_s23, 0 }
   0xb   : > { %p619_p8 = por %p124_p5, %p123_p3  ;;  %p161_p9 = scmp.lt.s32.totalorder %s547_s17, 3 }
   0xc   : > { %s625_s25 = scalar_select %p105_p7, %s535_s14, %s107_s21  }
   0xd   : > { %p162_p10 = pnand %p400_p6, %p161_p9 }
   0xe   : > { %p190_p11 = scmp.lt.s32.totalorder (!%p162_p10), %s539_s15, 1  ;;  %s186_s8 = sand.u32 (!%p162_p10), 1, %s531_s13  }
   0xf   : > { %165 = sbr.rel (%p162_p10) target bundleno = 248 (0xf8), region = 32  ;;  %s401_s9 = sshll.u32 (!%p162_p10), %s186_s8, 4 }
  0x10   : > { %s411_s10 = sshll.u32 (!%p162_p10), %s539_s15, 8  ;;  %s188_s11 = scalar_lea.vmem (!%p162_p10), [#allocation2], %s401_s9 }
  0x11   : > { %s320_s18 = sshll.u32 (!%p162_p10), %s188_s11, 4  ;;  %s318_s23 = scalar_lea.hbm (!%p162_p10), %s680_s3, %s411_s10  ;;  %s321_s18 = int_to_ptr.vmem [resolvable:$true] %s320_s18 }
  0x12   : > { %s304_s26 = scalar_lea.sflag (!%p162_p10), [#allocation3], %s186_s8  ;;  %s471_s27 = scalar_lea.vmem (!%p162_p10), %s321_s18, 256 }
  0x13   : > { %p472_p12 = scmp.ne.s32.totalorder (!%p162_p10), %s321_s18, %s471_s27 }
  0x14   : > { %v549_v0 = vmov 0.0   ;;  %v550_v1 = vmov 0   ;;  %v211_v2 = vld [vmem:[%s679_s2] sm:$0xff]  ;;  %s191_s28 = scalar_select %p190_p11, %s539_s15, 1  ;;  %vm221_vm0 = vcmask 1043456   ;;  %vm217_vm1 = vcmask 293888  }
  0x15   : > { %292 = vmatprep.mubr.f32.mxu0 %v549_v0  ;;  %470 = vset.pattern.permute.xlu0 %v550_v1  ;;  %v200_v13 = vld [vmem:[%s678_s1] sm:$0xff]  ;;  %p473_p13 = pnand %p472_p12, %p612_p4 }
  0x16   : > { %214 = vperm.xlu0 %470, %v211_v2   ;;  %s412_s29 = smul.u32 80, %s191_s28  ;;  %s551_s28 = smov [#allocation2]  }
  0x17   : > { %p474_p0 = pneg %p473_p13  ;;  %s475_s15 = sshll.u32 %s551_s28, 4  ;;  %s476_s15 = int_to_ptr.vmem [resolvable:$false] %s475_s15 }
  0x18   : > { %s197_s5 = scalar_lea.vmem %s677_s0, %s412_s29  ;;  %s477_s29 = scalar_lea.vmem %s476_s15, 512 }
  0x19   : > { %v210_v3 = vld [vmem:[%s197_s5 + $0x48] sm:$0xf]  ;;  %v209_v4 = vld [vmem:[%s197_s5 + $0x40] sm:$0xf]  ;;  %v208_v5 = vld [vmem:[%s197_s5 + $0x38] sm:$0xff]  ;;  %p478_p1 = scmp.lt.s32.totalorder %s321_s18, %s476_s15  ;;  %p479_p2 = scmp.lt.s32.totalorder %s477_s29, %s471_s27 }
  0x1a   : > { %403 = vmatprep.subr.msk.mxu0 %vm221_vm0, %v210_v3  ;;  %v207_v6 = vld [vmem:[%s197_s5 + $0x30] sm:$0xff]  ;;  %v206_v7 = vld [vmem:[%s197_s5 + $0x28] sm:$0xff]  ;;  %v205_v8 = vld [vmem:[%s197_s5 + $0x20] sm:$0xff] }
  0x1b   : > { %404 = vmatpush1.msk.msra.mxu0 %vm221_vm0, %v209_v4  ;;  %v204_v9 = vld [vmem:[%s197_s5 + $0x18] sm:$0xff]  ;;  %v203_v10 = vld [vmem:[%s197_s5 + $0x10] sm:$0xff]  ;;  %v202_v11 = vld [vmem:[%s197_s5 + $0x8] sm:$0xff]  ;;  %p480_p3 = por %p479_p2, %p478_p1 }
  0x1c   : > { %252 = vmatprep.subr.mxu0 %v208_v5  ;;  %v201_v12 = vld [vmem:[%s197_s5] sm:$0xff] }
  0x1d   : > { %253 = vmatpush1.msra.mxu0 %v207_v6  ;;  %p481_p5 = pnand %p480_p3, %p474_p0 }
  0x1e   : > { %254 = vmatprep.subr.mxu0 %v206_v7 }
  0x1f   : > { %255 = vmatpush1.msra.mxu0 %v205_v8 }
  0x20   : > { %256 = vmatprep.subr.mxu0 %v204_v9 }
  0x21   : > { %257 = vmatpush1.msra.mxu0 %v203_v10 }
  0x22   : > { %258 = vmatprep.subr.mxu0 %v202_v11 }
  0x23   : > { %259 = vmatpush1.msra.mxu0 %v201_v12 }
  0x24   : > { %405 = vmatmul.mubr.msk.f32.vlgmr.msra.gmra.mxu0 %vm217_vm1, %v200_v13 }
  0x91   : > { %v215_v14 = vpop.permute.xlu0 %214 }
  0xe4   : > { %v294_v15 = vpop.f32.mrf.mxu0 }
  0xe5   : > { %v295_v16 = vadd.f32 %v294_v15, %v215_v14 }
  0xe6   : > { %v296_v17 = vpop.f32.mrf.mxu0 }
  0xe7   : > { %v299_v18 = vmax.f32 %v295_v16, 0.0  ;;  %v297_v19 = vadd.f32 %v296_v17, %v215_v14 }
  0xe9   : > { %301 = vst [vmem:[%s188_s11] sm:$0xff] %v299_v18  ;;  %v300_v20 = vmax.f32 %v297_v19, 0.0 }
  0xeb   : > { %302 = vst [vmem:[%s188_s11 + $0x8] sm:$0xff] %v300_v20 }
  0xec   : > { %484 = shalt.err (!%p481_p5)
}
  0xed   : > { %s485_s30 = scalar_lea.hbm %s318_s23, 256  ;;  %s489_s6 = scalar_lea.hbm %s680_s3, 512 }
  0xee   : > { %p486_p6 = scmp.ne.s32.totalorder %s318_s23, %s485_s30  ;;  %p490_p10 = scmp.lt.s32.totalorder %s318_s23, %s680_s3 }
  0xef   : > { %p491_p11 = scmp.lt.s32.totalorder %s489_s6, %s485_s30 }
  0xf0   : > { %p487_p7 = pnand %p486_p6, %p612_p4 }
  0xf1   : > { %p492_p12 = por %p491_p11, %p490_p10 }
  0xf2   : > { %p488_p9 = pneg %p487_p7 }
  0xf4   : > { %p493_p13 = pnand %p492_p12, %p488_p9 }
  0xf6   : > { %496 = shalt.err (!%p493_p13)
}
  0xf7   : > { %413 = dma.vmem_to_hbm [thread:$0]  (%p612_p4), %s321_s18, 256, %s318_s23, %s304_s26  }
  0xf8 PF: > { %p419_p0 = scmp.ge.s32.totalorder %s547_s17, 2  ;;  %s332_s9 = sand.u32 1, %s527_s12  }
  0xf9   : > { %s333_s10 = scalar_lea.sflag [#allocation3], %s332_s9 }
  0xfa   : > { %p416_p1 = pnand %p419_p0, %p619_p8 }
  0xfc   : > { %p417_p2 = pneg %p416_p1 }
  0xfe   : > { %522 = dma.done.wait (%p417_p2), %s333_s10, 256  }
  0xff   : > { %524 = vsyncadd (%p417_p2), %s333_s10, 4294967040  ;;  %s16_s17 = sadd.s32 1, %s547_s17   ;;  %s683_s12 = smov %s531_s13 }
 0x100   : > { %p13_p3 = scmp.ge.s32.totalorder %s16_s17, 4   ;;  %s684_s13 = smov %s535_s14 }
 0x101   : > { %s685_s14 = smov %s625_s25  ;;  %s686_s15 = smov %s543_s16 }
 0x102   : > { %s687_s16 = smov %s689_s20  ;;  %15 = sbr.rel (!%p13_p3) target bundleno = 4 (0x4), region = 67 }
 0x107   :  { %338 = vsyncpa [#allocation3], 1 }
 0x108   :  { %340 = vsyncpa [#allocation3 + $0x1], 1 }

</bundles_post_ra>
